<compile_context>
chip_gen: v7x
topology: tpu7x:2x2x1
jax: 0.10.0
libtpu: 0.0.40
codegen_flags: <defaults>
</compile_context>

<pallas_src>
import functools

import jax
import jax.numpy as jnp
from jax.experimental import pallas as pl
from jax.experimental.pallas import tpu as pltpu


def _round_up(x, m):
    return ((x + m - 1) // m) * m


# --------------------------------------------------------------------------
# Fused kernel: both encoder means + softmin combination.
#   grid axis 0 iterates over K (reduction, "arbitrary").
#   acc_ref (VMEM, (8, 1)) rows 0/1 accumulate sum_k xs[k] * w_red_i[k].
#   On the last K step the means are formed (bias means are compile-time
#   constants), combined with the softmin weighting, and written out.
# --------------------------------------------------------------------------
def _fused_kernel(xs_ref, w_ref, comb_ref, m1_ref, m2_ref, acc_ref,
                  *, inv1, inv2, mb1, mb2, j1, j2):
    k = pl.program_id(0)

    @pl.when(k == 0)
    def _():
        acc_ref[...] = jnp.zeros_like(acc_ref)

    # (8, tk) * (1, tk) sublane-broadcast -> (8, tk); lane-reduce -> (8, 1).
    acc_ref[...] += jnp.sum(w_ref[...] * xs_ref[...], axis=1, keepdims=True)

    @pl.when(k == pl.num_programs(0) - 1)
    def _():
        acc = acc_ref[...]                       # (8, 1); rows 0, 1 used
        m1 = acc[0:1, :] * inv1 + mb1            # (1, 1) = mean(act1)
        m2 = acc[1:2, :] * inv2 + mb2            # (1, 1) = mean(act2)
        a1 = j1 * m1
        a2 = j2 * m2
        # Max-shifted softmin weighting (identical result, robust to large a).
        mx = jnp.maximum(-a1, -a2)
        e1 = jnp.exp(-a1 - mx)
        e2 = jnp.exp(-a2 - mx)
        comb = (a1 * e1 + a2 * e2) / (e1 + e2)
        comb_ref[...] = comb
        m1_ref[...] = m1
        m2_ref[...] = m2


def combined_activation_forward(xs_pad, w_red_pad, *, tk, inv1, inv2,
                                mb1, mb2, j1, j2):
    """Returns (comb, m1, m2) scalars.

    xs_pad:    (1, Kp)  batch-pre-summed, zero-padded flattened image.
    w_red_pad: (8, Kp)  rows 0/1 = per-encoder voxel-summed weights.
    """
    k_pad = xs_pad.shape[1]
    assert w_red_pad.shape == (8, k_pad) and k_pad % tk == 0

    kernel = functools.partial(
        _fused_kernel, inv1=float(inv1), inv2=float(inv2),
        mb1=float(mb1), mb2=float(mb2), j1=float(j1), j2=float(j2))

    comb, m1, m2 = pl.pallas_call(
        kernel,
        out_shape=(
            jax.ShapeDtypeStruct((1, 1), jnp.float32),   # comb
            jax.ShapeDtypeStruct((1, 1), jnp.float32),   # mean_act1
            jax.ShapeDtypeStruct((1, 1), jnp.float32),   # mean_act2
        ),
        grid_spec=pltpu.PrefetchScalarGridSpec(
            num_scalar_prefetch=0,
            grid=(k_pad // tk,),
            in_specs=[
                pl.BlockSpec((1, tk), lambda kk: (0, kk)),   # xs tile
                pl.BlockSpec((8, tk), lambda kk: (0, kk)),   # reduced-W tile
            ],
            out_specs=[
                pl.BlockSpec((1, 1), lambda kk: (0, 0)),
                pl.BlockSpec((1, 1), lambda kk: (0, 0)),
                pl.BlockSpec((1, 1), lambda kk: (0, 0)),
            ],
            scratch_shapes=[pltpu.VMEM((8, 1), jnp.float32)],
        ),
        compiler_params=pltpu.CompilerParams(
            dimension_semantics=("arbitrary",),   # K is a reduction axis
        ),
    )(xs_pad, w_red_pad)
    return comb[0, 0], m1[0, 0], m2[0, 0]


# --------------------------------------------------------------------------
# Module wrapper (mirrors Combined_Activation.forward).
# --------------------------------------------------------------------------
_TK_MAX = 65536   # per-step tiles: w (8, tk) f32 = 2 MiB, xs padded ~2 MiB;
                  # double-buffered ~8 MiB -> fits the default scoped VMEM on
                  # v5e / v6e / v7x with no vmem_limit_bytes override.


class CombinedActivation:
    def __init__(self, subject, region1, region2, j1, j2, *, in_features, key):
        # TODO(synk): real encoders are loaded from checkpoints
        # (temp_load_enc.load_encoder); synthesized here as dense maps.
        del subject, region1, region2
        self.j1 = float(j1)
        self.j2 = float(j2)
        self.num_voxels1 = 128
        self.num_voxels2 = 256
        k1, k2, k3, k4 = jax.random.split(key, 4)
        scale = 1.0 / jnp.sqrt(in_features)
        self.w1 = (jax.random.normal(k1, (in_features, self.num_voxels1),
                                     jnp.float32) * scale)
        self.b1 = jax.random.normal(k2, (1, self.num_voxels1), jnp.float32) * 0.1
        self.w2 = (jax.random.normal(k3, (in_features, self.num_voxels2),
                                     jnp.float32) * scale)
        self.b2 = jax.random.normal(k4, (1, self.num_voxels2), jnp.float32) * 0.1

        # Only mean(x @ W_i + b_i) ever leaves the module, so pre-reduce each
        # encoder's weights over the voxel axis ONCE at load time.  The kernel
        # then streams a lane-dense (8, K) slab instead of (K, 384), cutting
        # its dominant HBM traffic ~48x.  Bias means become host scalars.
        wr1 = jnp.sum(self.w1, axis=1)              # (K,)
        wr2 = jnp.sum(self.w2, axis=1)              # (K,)
        self.mean_b1 = float(jnp.mean(self.b1))
        self.mean_b2 = float(jnp.mean(self.b2))

        k_dim = int(in_features)
        tk = _round_up(k_dim, 128)
        if tk > _TK_MAX:
            tk = _TK_MAX
        self.tk = tk
        self.k_pad = _round_up(k_dim, tk)
        self.k_dim = k_dim
        # Static zero-padding of the (reduced) weights happens here, not in
        # the per-call hot path.  NOTE: could store as bfloat16 to halve the
        # stream again, kept f32 to preserve the 1e-4 rtol reference check.
        w_red = jnp.zeros((8, self.k_pad), jnp.float32)
        w_red = w_red.at[0, :k_dim].set(wr1)
        w_red = w_red.at[1, :k_dim].set(wr2)
        self.w_red = w_red

    def __call__(self, image):  # image: (N, C, H, W)
        n = image.shape[0]
        x = image.reshape(n, -1).astype(jnp.float32)      # glue: flatten NCHW
        # Pre-sum the batch axis once (mean is linear) -> single (1, K) vector;
        # the kernel then needs no per-step cross-sublane reduction.
        xs = jnp.sum(x, axis=0, keepdims=True)
        if self.k_pad != self.k_dim:
            xs = jnp.pad(xs, ((0, 0), (0, self.k_pad - self.k_dim)))
        inv1 = 1.0 / (n * self.num_voxels1)
        inv2 = 1.0 / (n * self.num_voxels2)
        return combined_activation_forward(
            xs, self.w_red, tk=self.tk, inv1=inv1, inv2=inv2,
            mb1=self.mean_b1, mb2=self.mean_b2, j1=self.j1, j2=self.j2)


# --------------------------------------------------------------------------
# Pure-JAX reference for correctness sanity check.
# --------------------------------------------------------------------------
def _reference(image, mod):
    n = image.shape[0]
    x = image.reshape(n, -1).astype(jnp.float32)
    hp = jax.lax.Precision.HIGHEST
    m1 = jnp.mean(jnp.dot(x, mod.w1, precision=hp) + mod.b1)
    m2 = jnp.mean(jnp.dot(x, mod.w2, precision=hp) + mod.b2)
    a1 = mod.j1 * m1
    a2 = mod.j2 * m2
    comb = (a1 * jnp.exp(-a1) + a2 * jnp.exp(-a2)) / (jnp.exp(-a1) + jnp.exp(-a2))
    return comb, m1, m2


if __name__ == "__main__":
    key = jax.random.PRNGKey(0)
    k_img, k_params = jax.random.split(key)

    # small shapes consistent with the forward: batch=2, channels=4, spatial=16
    N, C, H, W = 2, 4, 16, 16
    image = jax.random.normal(k_img, (N, C, H, W), jnp.float32)

    mod = CombinedActivation("subj01", "V1", "V4", j1=0.7, j2=0.3,
                             in_features=C * H * W, key=k_params)

    comb, m1, m2 = mod(image)
    jax.block_until_ready((comb, m1, m2))

    ref_comb, ref_m1, ref_m2 = _reference(image, mod)
    assert jnp.allclose(comb, ref_comb, rtol=1e-4, atol=1e-5)
    assert jnp.allclose(m1, ref_m1, rtol=1e-4, atol=1e-5)
    assert jnp.allclose(m2, ref_m2, rtol=1e-4, atol=1e-5)

    print("KERNEL_OK")
</pallas_src>

<mosaic_0001>
module attributes {stable_mosaic.version = 11 : i64} {
  func.func @_fused_kernel(%arg0: i32, %arg1: memref<1x1024xf32, #tpu.memory_space<vmem>>, %arg2: memref<8x1024xf32, #tpu.memory_space<vmem>>, %arg3: memref<1x1xf32, #tpu.memory_space<vmem>>, %arg4: memref<1x1xf32, #tpu.memory_space<vmem>>, %arg5: memref<1x1xf32, #tpu.memory_space<vmem>>, %arg6: memref<8x1xf32, #tpu.memory_space<vmem>>) attributes {dimension_semantics = [#tpu.dimension_semantics<arbitrary>], iteration_bounds = array<i64: 1>, scalar_prefetch = 0 : i64, scratch_operands = 1 : i64, tpu.core_type = #tpu.core_type<tc>, window_params = [{transform_indices = @transform_0, window_bounds = array<i64: 1, 1024>}, {transform_indices = @transform_1, window_bounds = array<i64: 8, 1024>}, {pipeline_mode = #tpu.pipeline_mode<synchronous>, transform_indices = @transform_2, window_bounds = array<i64: 1, 1>}, {pipeline_mode = #tpu.pipeline_mode<synchronous>, transform_indices = @transform_3, window_bounds = array<i64: 1, 1>}, {pipeline_mode = #tpu.pipeline_mode<synchronous>, transform_indices = @transform_4, window_bounds = array<i64: 1, 1>}]} {
    %c0_i32 = arith.constant 0 : i32
    %0 = arith.cmpi eq, %arg0, %c0_i32 : i32
    %1 = arith.extui %0 : i1 to i32
    %c0_i32_0 = arith.constant 0 : i32
    %2 = arith.cmpi ne, %1, %c0_i32_0 : i32
    scf.if %2 {
      %cst_10 = arith.constant 0.000000e+00 : f32
      %15 = vector.broadcast %cst_10 : f32 to vector<8x1xf32>
      %c0_11 = arith.constant 0 : index
      %c0_12 = arith.constant 0 : index
      %16 = vector.load %arg6[%c0_11, %c0_12] : memref<8x1xf32, #tpu.memory_space<vmem>>, vector<8x1xf32>
      tpu.vector_store %arg6[%c0_11, %c0_12], %15 {strides = array<i32>} : memref<8x1xf32, #tpu.memory_space<vmem>>, vector<8x1xf32>,
    } else {
    }
    %c0 = arith.constant 0 : index
    %c0_1 = arith.constant 0 : index
    %3 = vector.load %arg6[%c0, %c0_1] : memref<8x1xf32, #tpu.memory_space<vmem>>, vector<8x1xf32>
    %c0_2 = arith.constant 0 : index
    %c0_3 = arith.constant 0 : index
    %4 = vector.load %arg2[%c0_2, %c0_3] : memref<8x1024xf32, #tpu.memory_space<vmem>>, vector<8x1024xf32>
    %c0_4 = arith.constant 0 : index
    %c0_5 = arith.constant 0 : index
    %5 = vector.load %arg1[%c0_4, %c0_5] : memref<1x1024xf32, #tpu.memory_space<vmem>>, vector<1x1024xf32>
    %6 = vector.broadcast %5 : vector<1x1024xf32> to vector<8x1024xf32>
    %7 = arith.mulf %4, %6 : vector<8x1024xf32>
    %cst = arith.constant dense<0.000000e+00> : vector<8xf32>
    %8 = vector.multi_reduction <add>, %7, %cst [1] : vector<8x1024xf32> to vector<8xf32>
    %9 = vector.shape_cast %8 : vector<8xf32> to vector<8x1xf32>
    %10 = arith.addf %3, %9 : vector<8x1xf32>
    %c0_6 = arith.constant 0 : index
    %c0_7 = arith.constant 0 : index
    %11 = vector.load %arg6[%c0_6, %c0_7] : memref<8x1xf32, #tpu.memory_space<vmem>>, vector<8x1xf32>
    tpu.vector_store %arg6[%c0_6, %c0_7], %10 {strides = array<i32>} : memref<8x1xf32, #tpu.memory_space<vmem>>, vector<8x1xf32>,
    %c0_i32_8 = arith.constant 0 : i32
    %12 = arith.cmpi eq, %arg0, %c0_i32_8 : i32
    %13 = arith.extui %12 : i1 to i32
    %c0_i32_9 = arith.constant 0 : i32
    %14 = arith.cmpi ne, %13, %c0_i32_9 : i32
    scf.if %14 {
      %c0_10 = arith.constant 0 : index
      %c0_11 = arith.constant 0 : index
      %15 = vector.load %arg6[%c0_10, %c0_11] : memref<8x1xf32, #tpu.memory_space<vmem>>, vector<8x1xf32>
      %16 = vector.extract_strided_slice %15 {offsets = [0, 0], sizes = [1, 1], strides = [1, 1]} : vector<8x1xf32> to vector<1x1xf32>
      %cst_12 = arith.constant 3.906250e-03 : f32
      %17 = vector.broadcast %cst_12 : f32 to vector<1x1xf32>
      %18 = arith.mulf %16, %17 : vector<1x1xf32>
      %cst_13 = arith.constant 0.00169614796 : f32
      %19 = vector.broadcast %cst_13 : f32 to vector<1x1xf32>
      %20 = arith.addf %18, %19 : vector<1x1xf32>
      %21 = vector.extract_strided_slice %15 {offsets = [1, 0], sizes = [1, 1], strides = [1, 1]} : vector<8x1xf32> to vector<1x1xf32>
      %cst_14 = arith.constant 0.001953125 : f32
      %22 = vector.broadcast %cst_14 : f32 to vector<1x1xf32>
      %23 = arith.mulf %21, %22 : vector<1x1xf32>
      %cst_15 = arith.constant -0.00587471388 : f32
      %24 = vector.broadcast %cst_15 : f32 to vector<1x1xf32>
      %25 = arith.addf %23, %24 : vector<1x1xf32>
      %cst_16 = arith.constant 0.699999988 : f32
      %26 = vector.broadcast %cst_16 : f32 to vector<1x1xf32>
      %27 = arith.mulf %26, %20 : vector<1x1xf32>
      %cst_17 = arith.constant 3.000000e-01 : f32
      %28 = vector.broadcast %cst_17 : f32 to vector<1x1xf32>
      %29 = arith.mulf %28, %25 : vector<1x1xf32>
      %cst_18 = arith.constant 0.000000e+00 : f32
      %30 = vector.broadcast %cst_18 : f32 to vector<1x1xf32>
      %31 = arith.subf %30, %27 : vector<1x1xf32>
      %cst_19 = arith.constant 0.000000e+00 : f32
      %32 = vector.broadcast %cst_19 : f32 to vector<1x1xf32>
      %33 = arith.subf %32, %29 : vector<1x1xf32>
      %34 = arith.maximumf %31, %33 : vector<1x1xf32>
      %cst_20 = arith.constant 0.000000e+00 : f32
      %35 = vector.broadcast %cst_20 : f32 to vector<1x1xf32>
      %36 = arith.subf %35, %27 : vector<1x1xf32>
      %37 = arith.subf %36, %34 : vector<1x1xf32>
      %38 = math.exp %37 : vector<1x1xf32>
      %cst_21 = arith.constant 0.000000e+00 : f32
      %39 = vector.broadcast %cst_21 : f32 to vector<1x1xf32>
      %40 = arith.subf %39, %29 : vector<1x1xf32>
      %41 = arith.subf %40, %34 : vector<1x1xf32>
      %42 = math.exp %41 : vector<1x1xf32>
      %43 = arith.mulf %27, %38 : vector<1x1xf32>
      %44 = arith.mulf %29, %42 : vector<1x1xf32>
      %45 = arith.addf %43, %44 : vector<1x1xf32>
      %46 = arith.addf %38, %42 : vector<1x1xf32>
      %47 = arith.divf %45, %46 : vector<1x1xf32>
      %c0_22 = arith.constant 0 : index
      %c0_23 = arith.constant 0 : index
      %48 = vector.load %arg3[%c0_22, %c0_23] : memref<1x1xf32, #tpu.memory_space<vmem>>, vector<1x1xf32>
      tpu.vector_store %arg3[%c0_22, %c0_23], %47 {strides = array<i32>} : memref<1x1xf32, #tpu.memory_space<vmem>>, vector<1x1xf32>,
      %c0_24 = arith.constant 0 : index
      %c0_25 = arith.constant 0 : index
      %49 = vector.load %arg4[%c0_24, %c0_25] : memref<1x1xf32, #tpu.memory_space<vmem>>, vector<1x1xf32>
      tpu.vector_store %arg4[%c0_24, %c0_25], %20 {strides = array<i32>} : memref<1x1xf32, #tpu.memory_space<vmem>>, vector<1x1xf32>,
      %c0_26 = arith.constant 0 : index
      %c0_27 = arith.constant 0 : index
      %50 = vector.load %arg5[%c0_26, %c0_27] : memref<1x1xf32, #tpu.memory_space<vmem>>, vector<1x1xf32>
      tpu.vector_store %arg5[%c0_26, %c0_27], %25 {strides = array<i32>} : memref<1x1xf32, #tpu.memory_space<vmem>>, vector<1x1xf32>,
    } else {
    }
    return
  }
  func.func @transform_0(%arg0: i32) -> (i32, i32) {
    %c0_i32 = arith.constant 0 : i32
    %c0_i32_0 = arith.constant 0 : i32
    return %c0_i32, %arg0 : i32, i32
  }
  func.func @transform_1(%arg0: i32) -> (i32, i32) {
    %c0_i32 = arith.constant 0 : i32
    %c0_i32_0 = arith.constant 0 : i32
    return %c0_i32, %arg0 : i32, i32
  }
  func.func @transform_2(%arg0: i32) -> (i32, i32) {
    %c0_i32 = arith.constant 0 : i32
    %c0_i32_0 = arith.constant 0 : i32
    %c0_i32_1 = arith.constant 0 : i32
    return %c0_i32, %c0_i32_0 : i32, i32
  }
  func.func @transform_3(%arg0: i32) -> (i32, i32) {
    %c0_i32 = arith.constant 0 : i32
    %c0_i32_0 = arith.constant 0 : i32
    %c0_i32_1 = arith.constant 0 : i32
    return %c0_i32, %c0_i32_0 : i32, i32
  }
  func.func @transform_4(%arg0: i32) -> (i32, i32) {
    %c0_i32 = arith.constant 0 : i32
    %c0_i32_0 = arith.constant 0 : i32
    %c0_i32_1 = arith.constant 0 : i32
    return %c0_i32, %c0_i32_0 : i32, i32
  }
}

</mosaic_0001>

<bundles_post_ra>
// kernel: tpu_custom_call.1
= control target key start
LH: loop header
LB: loop body
LE: loop exit
PB: predicated region body
PF: predicated region fallthrough
CT: control target
= control target key end

     0   :  { %10 = vsyncpa [#allocation4], 0  ;;  %s435_s0 = inlined_call_operand.hbm [shape: f32[1,1024], index: 0, kind: input, shape index: {}]   ;;  %s436_s1 = inlined_call_operand.hbm [shape: f32[8,1024], index: 1, kind: input, shape index: {}]   ;;  %s437_s2 = inlined_call_operand.hbm [shape: f32[1,1], index: 2, kind: output, shape index: {0}]   ;;  %s438_s3 = inlined_call_operand.hbm [shape: f32[1,1], index: 3, kind: output, shape index: {1}]   ;;  %s439_s4 = inlined_call_operand.hbm [shape: f32[1,1], index: 4, kind: output, shape index: {2}]  }
   0x1   :  { %11 = vsyncpa [#allocation7], 0 }
   0x2   :  { %12 = vsyncpa [#allocation5], 0 }
   0x3   :  { %13 = vsyncpa [#allocation10], 0  ;;  %s332_s15 = smov [#allocation3]   ;;  %s333_s17 = smov [#allocation6]  }
   0x4   :  { %s20_s16 = sshll.u32 %s332_s15, 4  ;;  %s30_s18 = sshll.u32 %s333_s17, 4  ;;  %s21_s16 = int_to_ptr.vmem [resolvable:$true] %s20_s16  ;;  %s31_s18 = int_to_ptr.vmem [resolvable:$true] %s30_s18 }
   0x5   :  { %s214_s21 = scalar_lea.hbm %s435_s0, 128 }
   0x6   :  { %p215_p0 = scmp.ne.s32.totalorder %s435_s0, %s214_s21  ;;  %p218_p1 = scmp.lt.u32.totalorder %s214_s21, %s435_s0 }
   0x8   :  { %p220_p2 = pnand %p218_p1, %p215_p0 }
   0xa   :  { %223 = shalt.err (!%p220_p2)
}
   0xb   :  { %s224_s26 = scalar_lea.vmem %s21_s16, 128  ;;  %p229_p4 = scmp.lt.s32.totalorder %s21_s16, %s21_s16 }
   0xc   :  { %p225_p3 = scmp.ne.s32.totalorder %s21_s16, %s224_s26  ;;  %p230_p5 = scmp.lt.s32.totalorder %s224_s26, %s224_s26 }
   0xe   :  { %p231_p6 = por %p230_p5, %p229_p4 }
  0x10   :  { %p232_p7 = pnand %p231_p6, %p225_p3 }
  0x12   :  { %235 = shalt.err (!%p232_p7)
}
  0x13   :  { %23 = dma.hbm_to_vmem [thread:$0]  %s435_s0, 128, %s21_s16, [#allocation4]  }
  0x14   :  { %s236_s5 = scalar_lea.hbm %s436_s1, 1024 }
  0x15   :  { %p237_p8 = scmp.ne.s32.totalorder %s436_s1, %s236_s5  ;;  %p240_p9 = scmp.lt.u32.totalorder %s236_s5, %s436_s1 }
  0x17   :  { %p242_p10 = pnand %p240_p9, %p237_p8 }
  0x19   :  { %245 = shalt.err (!%p242_p10)
}
  0x1a   :  { %s246_s10 = scalar_lea.vmem %s31_s18, 1024  ;;  %p251_p12 = scmp.lt.s32.totalorder %s31_s18, %s31_s18 }
  0x1b   :  { %p247_p11 = scmp.ne.s32.totalorder %s31_s18, %s246_s10  ;;  %p252_p13 = scmp.lt.s32.totalorder %s246_s10, %s246_s10 }
  0x1d   :  { %p253_p0 = por %p252_p13, %p251_p12 }
  0x1f   :  { %p254_p1 = pnand %p253_p0, %p247_p11 }
  0x21   :  { %257 = shalt.err (!%p254_p1)
}
  0x22   :  { %33 = dma.hbm_to_vmem [thread:$0]  %s436_s1, 1024, %s31_s18, [#allocation7]  }
  0x23   :  { %324 = dma.done.wait [#allocation4], 128  }
  0x24   :  { %325 = vsyncadd [#allocation4], 4294967168 }
  0x25   :  { %326 = dma.done.wait [#allocation7], 1024  }
  0x26   :  { %327 = vsyncadd [#allocation7], 4294966272  ;;  %v57_v0 = vlaneseq  ;;  %vm44_vm0 = vcmask 7168   ;;  %v334_v1 = vmov 0.0   ;;  %v47_v7 = vld [vmem:[#allocation6] sm:$0xff]  ;;  %v48_v9 = vld [vmem:[#allocation6 + $0x8] sm:$0xff] }
  0x27   :  { %45 = vst.msk [vmem:[#allocation2] sm:$0xff] %vm44_vm0, %v334_v1  ;;  %v49_v10 = vld [vmem:[#allocation6 + $0x10] sm:$0xff]  ;;  %v55_v11 = vld [vmem:[#allocation3] sm:$0xff]  ;;  %v51_v23 = vld [vmem:[#allocation6 + $0x20] sm:$0xff]  ;;  %s335_s1 = smov [#allocation9]   ;;  %s336_s13 = smov [#allocation11]  }
  0x28   :  { %v58_v2 = vshrl.u32 %v57_v0, 7  ;;  %v50_v17 = vld [vmem:[#allocation6 + $0x18] sm:$0xff]  ;;  %v52_v28 = vld [vmem:[#allocation6 + $0x28] sm:$0xff]  ;;  %v53_v32 = vld [vmem:[#allocation6 + $0x30] sm:$0xff]  ;;  %s175_s12 = sshll.u32 %s335_s1, 4  ;;  %s185_s14 = sshll.u32 %s336_s13, 4  ;;  %s176_s12 = int_to_ptr.vmem [resolvable:$true] %s175_s12  ;;  %s389_s14 = int_to_ptr.vmem [resolvable:$true] %s185_s14 }
  0x29   :  { %v54_v36 = vld [vmem:[#allocation6 + $0x38] sm:$0xff]  ;;  %vm154_vm1 = vcmask 0   ;;  %vm157_vm2 = vcmask 1025   ;;  %s258_s15 = scalar_lea.vmem %s176_s12, 16  ;;  %s262_s16 = scalar_lea.vmem %s176_s12, 32 }
  0x2a   :  { %v59_v3 = vsub.s32 0, %v58_v2  ;;  %v63_v4 = vsub.s32 1, %v58_v2  ;;  %v67_v5 = vsub.s32 2, %v58_v2  ;;  %v71_v6 = vsub.s32 3, %v58_v2  ;;  %p259_p2 = scmp.ne.s32.totalorder %s176_s12, %s258_s15  ;;  %p263_p3 = scmp.lt.s32.totalorder %s176_s12, %s176_s12 }
  0x2b   :  { %v75_v8 = vsub.s32 4, %v58_v2  ;;  %v79_v12 = vsub.s32 5, %v58_v2  ;;  %v83_v18 = vsub.s32 6, %v58_v2  ;;  %v87_v25 = vsub.s32 7, %v58_v2  ;;  %p264_p4 = scmp.lt.s32.totalorder %s262_s16, %s258_s15 }
  0x2c   :  { %v60_v13 = vrot.slane %v55_v11, %v59_v3  ;;  %v64_v14 = vrot.slane %v55_v11, %v63_v4  ;;  %v68_v15 = vrot.slane %v55_v11, %v67_v5  ;;  %v72_v16 = vrot.slane %v55_v11, %v71_v6 }
  0x2d   :  { %v76_v19 = vrot.slane %v55_v11, %v75_v8  ;;  %v80_v24 = vrot.slane %v55_v11, %v79_v12  ;;  %v84_v29 = vrot.slane %v55_v11, %v83_v18  ;;  %v88_v33 = vrot.slane %v55_v11, %v87_v25  ;;  %p265_p5 = por %p264_p4, %p263_p3 }
  0x2e   :  { %v97_v20 = vmul.f32 %v60_v13, %v47_v7  ;;  %v98_v21 = vmul.f32 %v64_v14, %v48_v9  ;;  %v99_v22 = vmul.f32 %v68_v15, %v49_v10  ;;  %v100_v26 = vmul.f32 %v72_v16, %v50_v17  ;;  %v46_v43 = vld [vmem:[#allocation2] sm:$0xff] }
  0x2f   :  { %v101_v30 = vmul.f32 %v76_v19, %v51_v23  ;;  %v102_v34 = vmul.f32 %v80_v24, %v52_v28  ;;  %v103_v37 = vmul.f32 %v84_v29, %v53_v32  ;;  %v104_v39 = vmul.f32 %v88_v33, %v54_v36  ;;  %p266_p6 = pnand %p265_p5, %p259_p2 }
  0x30   :  { %v105_v27 = vadd.f32 %v98_v21, %v97_v20 }
  0x32   :  { %v106_v31 = vadd.f32 %v105_v27, %v99_v22 }
  0x34   :  { %v107_v35 = vadd.f32 %v106_v31, %v100_v26 }
  0x36   :  { %v108_v38 = vadd.f32 %v107_v35, %v101_v30 }
  0x38   :  { %v109_v40 = vadd.f32 %v108_v38, %v102_v34 }
  0x3a   :  { %v110_v41 = vadd.f32 %v109_v40, %v103_v37 }
  0x3c   :  { %v111_v42 = vadd.f32 %v110_v41, %v104_v39 }
  0x3e   :  { %112 = vadd.xlane.f32.xlu0 %v111_v42 }
  0xcb   :  { %v113_v44 = vpop.xlane.xlu0 %112 }
  0xcc   :  { %v114_v45 = vadd.f32 %v113_v44, %v46_v43 }
  0xce   :  { %116 = vst.msk [vmem:[#allocation2] sm:$0xff] %vm44_vm0, %v114_v45 }
  0xd5   :  { %v120_v46 = vld [vmem:[#allocation2] sm:$0xff] }
  0xd6   :  { %v121_v47 = vmul.f32 0.00390625, %v120_v46  ;;  %v123_v48 = vmul.f32 0.001953125, %v120_v46 }
  0xd8   :  { %v122_v49 = vadd.f32 0.001696148, %v121_v47  ;;  %v124_v50 = vadd.f32 -0.005874714, %v123_v48 }
  0xda   :  { %v125_v51 = vmul.f32 0.7, %v122_v49  ;;  %v126_v52 = vmul.f32 0.3, %v124_v50  ;;  %156 = vst.msk [vmem:[#allocation9] sm:$0x1] %vm154_vm1, %v122_v49 }
  0xdb   :  { %158 = vst.msk [vmem:[#allocation11 - $0x1] sm:$0x2] %vm157_vm2, %v124_v50 }
  0xdc   :  { %269 = shalt.err (!%p266_p6)
}
  0xdd   :  { %s270_s19 = scalar_lea.hbm %s438_s3, 16 }
  0xde   :  { %p271_p7 = scmp.ne.s32.totalorder %s438_s3, %s270_s19  ;;  %p274_p8 = scmp.lt.u32.totalorder %s270_s19, %s438_s3 }
  0xe0   :  { %p276_p9 = pnand %p274_p8, %p271_p7 }
  0xe2   :  { %279 = shalt.err (!%p276_p9)
}
  0xe3   :  { %178 = dma.vmem_to_hbm [thread:$0]  %s176_s12, 16, %s438_s3, [#allocation10]   ;;  %v128_v53 = vsub.f32 0.0, %v126_v52 }
  0xe4   :  { %s280_s26 = scalar_lea.vmem %s389_s14, 16  ;;  %s284_s27 = scalar_lea.vmem %s389_s14, 32 }
  0xe5   :  { %p281_p10 = scmp.ne.s32.totalorder %s389_s14, %s280_s26  ;;  %p285_p11 = scmp.lt.s32.totalorder %s389_s14, %s389_s14 }
  0xe6   :  { %p286_p12 = scmp.lt.s32.totalorder %s284_s27, %s280_s26 }
  0xe8   :  { %p287_p13 = por %p286_p12, %p285_p11 }
  0xea   :  { %p288_p0 = pnand %p287_p13, %p281_p10 }
  0xec   :  { %291 = shalt.err (!%p288_p0)
}
  0xed   :  { %s292_s30 = scalar_lea.hbm %s439_s4, 16 }
  0xee   :  { %p293_p1 = scmp.ne.s32.totalorder %s439_s4, %s292_s30  ;;  %p296_p2 = scmp.lt.u32.totalorder %s292_s30, %s439_s4 }
  0xf0   :  { %p298_p3 = pnand %p296_p2, %p293_p1 }
  0xf2   :  { %301 = shalt.err (!%p298_p3)
}
  0xf3   :  { %188 = dma.vmem_to_hbm [thread:$0]  %s389_s14, 16, %s439_s4, [#allocation10]   ;;  %v127_v54 = vsub.f32 0.0, %v125_v51  ;;  %v130_v55 = vrot.slane %v128_v53, 1 }
  0xf4   :  { %s337_s10 = smov [#allocation8]  }
  0xf5   :  { %v132_v56 = vmax.f32 %v127_v54, %v130_v55  ;;  %s165_s4 = sshll.u32 %s337_s10, 4  ;;  %s166_s4 = int_to_ptr.vmem [resolvable:$true] %s165_s4 }
  0xf6   :  { %s302_s0 = scalar_lea.vmem %s166_s4, 16  ;;  %s306_s11 = scalar_lea.vmem %s166_s4, 32 }
  0xf7   :  { %v133_v57 = vsub.f32 %v127_v54, %v132_v56  ;;  %v137_v58 = vrot.slane %v132_v56, 7  ;;  %p303_p4 = scmp.ne.s32.totalorder %s166_s4, %s302_s0  ;;  %p307_p5 = scmp.lt.s32.totalorder %s166_s4, %s166_s4 }
  0xf8   :  { %p308_p6 = scmp.lt.s32.totalorder %s306_s11, %s302_s0 }
  0xf9   :  { %v139_v59 = vsub.f32 %v128_v53, %v137_v58  ;;  %v134_v60 = vmul.f32 1.442695, %v133_v57 }
  0xfa   :  { %p309_p7 = por %p308_p6, %p307_p5 }
  0xfb   :  { %v140_v61 = vmul.f32 1.442695, %v139_v59 }
  0xfc   :  { %p310_p8 = pnand %p309_p7, %p303_p4 }
  0xfd   :  { %208 = vpow2.f32 %v140_v61 }
  0xfe   :  { %210 = vpow2.f32 %v134_v60 }
 0x107   :  { %v209_v62 = vpop.eup %208 }
 0x108   :  { %v149_v63 = vrot.slane %v209_v62, 1  ;;  %v211_v0 = vpop.eup %210  ;;  %v143_v2 = vmul.f32 %v209_v62, %v126_v52 }
 0x109   :  { %v142_v4 = vmul.f32 %v211_v0, %v125_v51 }
 0x10a   :  { %v151_v1 = vadd.f32 %v211_v0, %v149_v63  ;;  %v145_v3 = vrot.slane %v143_v2, 1 }
 0x10c   :  { %212 = vrcp.f32 %v151_v1  ;;  %v147_v5 = vadd.f32 %v145_v3, %v142_v4 }
 0x116   :  { %v213_v6 = vpop.eup %212 }
 0x117   :  { %v153_v7 = vmul.f32 %v213_v6, %v147_v5 }
 0x119   :  { %155 = vst.msk [vmem:[#allocation8] sm:$0x1] %vm154_vm1, %v153_v7 }
 0x11a   :  { %313 = shalt.err (!%p310_p8)
}
 0x11b   :  { %s314_s13 = scalar_lea.hbm %s437_s2, 16 }
 0x11c   :  { %p315_p9 = scmp.ne.s32.totalorder %s437_s2, %s314_s13  ;;  %p318_p10 = scmp.lt.u32.totalorder %s314_s13, %s437_s2 }
 0x11e   :  { %p320_p11 = pnand %p318_p10, %p315_p9 }
 0x120   :  { %323 = shalt.err (!%p320_p11)
}
 0x121   :  { %168 = dma.vmem_to_hbm [thread:$0]  %s166_s4, 16, %s437_s2, [#allocation5]  }
 0x122   :  { %328 = dma.done.wait [#allocation5], 16  }
 0x123   :  { %329 = vsyncadd [#allocation5], 4294967280 }
 0x124   :  { %330 = dma.done.wait [#allocation10], 32  }
 0x125   :  { %331 = vsyncadd [#allocation10], 4294967264 }
 0x126   :  { %198 = vsyncpa [#allocation4], 1 }
 0x127   :  { %199 = vsyncpa [#allocation7], 1 }
 0x128   :  { %200 = vsyncpa [#allocation5], 1 }
 0x129   :  { %201 = vsyncpa [#allocation10], 1 }

</bundles_post_ra>
